<compile_context>
chip_gen: v7x
topology: tpu7x:2x2x1
jax: 0.10.0
libtpu: 0.0.40
codegen_flags: <defaults>
</compile_context>

<pallas_src>
import jax
import jax.numpy as jnp
from jax.experimental import pallas as pl
from jax.experimental.pallas import tpu as pltpu


def _round_up(n, m):
    return (n + m - 1) // m * m


def _group_gru_kernel(x_ref, h_ref, w_ref, out_ref):
    # x_ref  : (b_tile, g_tile, I)        native batch-major layout
    # h_ref  : (b_tile, g_tile, H)
    # w_ref  : (g_tile, I+H, 4H)          fused [W_rz | Wx_n | Wh_n] per group
    # out_ref: (b_tile, g_tile, H)
    g_tile = out_ref.shape[1]
    H = out_ref.shape[2]

    x = x_ref[...]
    h = h_ref[...]

    hys = []
    for g in range(g_tile):  # static unroll; g_tile is kept small by the wrapper
        x_g = x[:, g, :]                                  # (b_tile, I)
        h_g = h[:, g, :]                                  # (b_tile, H)
        xh = jnp.concatenate([x_g, h_g], axis=-1)         # (b_tile, I+H)

        # Single fused MXU pass per group: K = I+H, N = 4H, f32 accumulation.
        gates = jnp.dot(xh, w_ref[g], preferred_element_type=jnp.float32)

        rz_pre = gates[:, : 2 * H]                        # i_r+h_r | i_i+h_i
        i_n = gates[:, 2 * H: 3 * H]
        h_n = gates[:, 3 * H: 4 * H]

        # sigmoid(v) == 0.5*(tanh(0.5*v)+1): single EUP transcendental.
        rz = 0.5 * (jnp.tanh(0.5 * rz_pre) + 1.0)
        r = rz[:, :H]
        z = rz[:, H:]
        n = jnp.tanh(i_n + r * h_n)
        hy = n + z * (h_g.astype(jnp.float32) - n)
        hys.append(hy)

    out_ref[...] = jnp.stack(hys, axis=1).astype(out_ref.dtype)


def _pick_tiles(G, Bp, I, H, itemsize, budget, sub):
    """Choose (g_tile, b_tile): g_tile = G or a multiple-of-8 divisor of G
    (keeps the second-to-last block dim layout-legal); b_tile a multiple-of-sub
    divisor of Bp such that one buffer set fits the VMEM budget."""
    K = I + H
    N4 = 4 * H
    per_group_w = K * N4 * itemsize

    if G <= 32 and G * per_group_w <= budget // 2:
        g_tile = G
    else:
        cands = [d for d in range(8, G, 8)
                 if G % d == 0 and d <= 32 and d * per_group_w <= budget // 2]
        g_tile = max(cands) if cands else G
        # TODO(synk): very large G with no multiple-of-8 divisor falls back to
        # a single full-G weight block (longer compile, more VMEM).

    def blk_bytes(bt):
        io = bt * g_tile * (I + 2 * H) * itemsize          # x + h + out blocks
        w = g_tile * per_group_w
        f32_tmp = bt * (N4 + 3 * H) * 4 + bt * g_tile * H * 4
        return io + w + f32_tmp

    b_tile = Bp
    while b_tile > sub and blk_bytes(b_tile) > budget:
        nt = b_tile - sub
        while nt > sub and Bp % nt:
            nt -= sub
        b_tile = nt
    return g_tile, b_tile


def group_gru_cell(x, hidden, wx, wh):
    """x:(B,G,I) hidden:(B,G,H) wx:(G,I,3H) wh:(G,H,3H) -> hy:(B,G,H)."""
    B, G, I = x.shape
    H = hidden.shape[-1]
    assert wx.shape == (G, I, 3 * H)
    assert wh.shape == (G, H, 3 * H)
    dtype = hidden.dtype
    itemsize = jnp.dtype(dtype).itemsize
    K = I + H
    N4 = 4 * H

    # ---- fused weight prep (one-time, weights are small) --------------------
    # columns [0,2H): W_rz (x-rows = Wx_rz, h-rows = Wh_rz)  -> i_* + h_* summed
    # columns [2H,3H): Wx_n over x-rows, zeros over h-rows   -> i_n
    # columns [3H,4H): zeros over x-rows, Wh_n over h-rows   -> h_n
    zx = jnp.zeros((G, I, H), dtype=dtype)
    zh = jnp.zeros((G, H, H), dtype=dtype)
    w_top = jnp.concatenate(
        [wx[:, :, : 2 * H].astype(dtype), wx[:, :, 2 * H:].astype(dtype), zx], axis=2)
    w_bot = jnp.concatenate(
        [wh[:, :, : 2 * H].astype(dtype), zh, wh[:, :, 2 * H:].astype(dtype)], axis=2)
    w_all = jnp.concatenate([w_top, w_bot], axis=1)        # (G, I+H, 4H)

    # ---- batch padding to the dtype sublane tile (only re-layout we do) ------
    sub = {1: 32, 2: 16}.get(itemsize, 8)
    Bp = _round_up(B, sub)
    x_p = x.astype(dtype)
    h_p = hidden
    if Bp != B:
        x_p = jnp.pad(x_p, ((0, Bp - B), (0, 0), (0, 0)))
        h_p = jnp.pad(h_p, ((0, Bp - B), (0, 0), (0, 0)))

    # ---- generation-aware VMEM budget ----------------------------------------
    try:
        vmem_cap = int(pltpu.get_tpu_info().vmem_capacity_bytes)
    except Exception:  # fall back to the smallest (v7x per-TC) capacity
        vmem_cap = 64 << 20
    usable = max(vmem_cap - (8 << 20), 16 << 20)   # leave headroom for compiler scratch
    budget = max(usable // 3, 4 << 20)             # single-buffer-set budget

    g_tile, b_tile = _pick_tiles(G, Bp, I, H, itemsize, budget, sub)
    grid = (G // g_tile, Bp // b_tile)

    blk_io = b_tile * g_tile * (I + 2 * H) * itemsize
    blk_w = g_tile * K * N4 * itemsize
    f32_tmp = b_tile * (N4 + 3 * H) * 4 + b_tile * g_tile * H * 4
    vmem_needed = 2 * blk_io + 2 * blk_w + f32_tmp + (2 << 20)
    vmem_limit = int(min(max(vmem_needed, 32 << 20), usable))

    cost = pl.CostEstimate(
        flops=2 * Bp * G * K * N4,
        transcendentals=3 * Bp * G * H,
        bytes_accessed=int((x_p.size + h_p.size + w_all.size + Bp * G * H) * itemsize),
    )

    out_p = pl.pallas_call(
        _group_gru_kernel,
        out_shape=jax.ShapeDtypeStruct((Bp, G, H), dtype),
        grid_spec=pltpu.PrefetchScalarGridSpec(
            num_scalar_prefetch=0,
            grid=grid,
            in_specs=[
                pl.BlockSpec((b_tile, g_tile, I), lambda g, b: (b, g, 0)),
                pl.BlockSpec((b_tile, g_tile, H), lambda g, b: (b, g, 0)),
                # weight index_map ignores the batch axis -> same block index on
                # consecutive batch steps -> Pallas skips the re-DMA.
                pl.BlockSpec((g_tile, K, N4), lambda g, b: (g, 0, 0)),
            ],
            out_specs=pl.BlockSpec((b_tile, g_tile, H), lambda g, b: (b, g, 0)),
        ),
        compiler_params=pltpu.CompilerParams(
            dimension_semantics=("parallel", "parallel"),
            vmem_limit_bytes=vmem_limit,
        ),
        cost_estimate=cost,
    )(x_p, h_p, w_all)

    return out_p[:B] if Bp != B else out_p


def group_gru_cell_ref(x, hidden, wx, wh):
    """Pure-JAX reference mirroring the PyTorch module (f32 math)."""
    gate_x = jnp.einsum("bgi,gio->bgo", x.astype(jnp.float32), wx.astype(jnp.float32))
    gate_h = jnp.einsum("bgh,gho->bgo", hidden.astype(jnp.float32), wh.astype(jnp.float32))
    i_r, i_i, i_n = jnp.split(gate_x, 3, axis=2)
    h_r, h_i, h_n = jnp.split(gate_h, 3, axis=2)
    r = jax.nn.sigmoid(i_r + h_r)
    z = jax.nn.sigmoid(i_i + h_i)
    n = jnp.tanh(i_n + r * h_n)
    return n + z * (hidden.astype(jnp.float32) - n)


if __name__ == "__main__":
    batch = 2
    num_grus = 4
    input_size = 16
    hidden_size = 32

    key = jax.random.PRNGKey(0)
    kx, kh, kwx, kwh = jax.random.split(key, 4)

    x = jax.random.normal(kx, (batch, num_grus, input_size), dtype=jnp.float32)
    hidden = jax.random.normal(kh, (batch, num_grus, hidden_size), dtype=jnp.float32)
    # NOTE: the module's reset_parameters() sets every weight to 1.0; a small
    # deterministic random init keeps the gates unsaturated so the numerical
    # check is meaningful.  Forward semantics are identical.
    wx = 0.01 * jax.random.normal(kwx, (num_grus, input_size, 3 * hidden_size), jnp.float32)
    wh = 0.01 * jax.random.normal(kwh, (num_grus, hidden_size, 3 * hidden_size), jnp.float32)

    # f32 path (tight tolerance)
    out = jax.block_until_ready(group_gru_cell(x, hidden, wx, wh))
    ref = group_gru_cell_ref(x, hidden, wx, wh)
    assert out.shape == (batch, num_grus, hidden_size)
    assert jnp.allclose(out, ref, atol=1e-5, rtol=1e-5), "f32 mismatch vs reference"

    # bf16 path (MXU-native operands, f32 accumulation; looser tolerance)
    xb, hb = x.astype(jnp.bfloat16), hidden.astype(jnp.bfloat16)
    wxb, whb = wx.astype(jnp.bfloat16), wh.astype(jnp.bfloat16)
    out_bf16 = jax.block_until_ready(group_gru_cell(xb, hb, wxb, whb))
    ref_bf16 = group_gru_cell_ref(xb, hb, wxb, whb)
    assert out_bf16.shape == (batch, num_grus, hidden_size)
    assert jnp.allclose(out_bf16.astype(jnp.float32), ref_bf16,
                        atol=5e-2, rtol=5e-2), "bf16 mismatch vs reference"

    print("KERNEL_OK")
</pallas_src>

<mosaic_0001>
module attributes {stable_mosaic.version = 11 : i64} {
  func.func @_group_gru_kernel(%arg0: i32, %arg1: i32, %arg2: memref<8x4x16xf32, #tpu.memory_space<vmem>>, %arg3: memref<8x4x32xf32, #tpu.memory_space<vmem>>, %arg4: memref<4x48x128xf32, #tpu.memory_space<vmem>>, %arg5: memref<8x4x32xf32, #tpu.memory_space<vmem>>) attributes {dimension_semantics = [#tpu.dimension_semantics<parallel>, #tpu.dimension_semantics<parallel>], iteration_bounds = array<i64: 1, 1>, scalar_prefetch = 0 : i64, scratch_operands = 0 : i64, tpu.core_type = #tpu.core_type<tc>, window_params = [{transform_indices = @transform_0, window_bounds = array<i64: 8, 4, 16>}, {transform_indices = @transform_1, window_bounds = array<i64: 8, 4, 32>}, {transform_indices = @transform_2, window_bounds = array<i64: 4, 48, 128>}, {transform_indices = @transform_3, window_bounds = array<i64: 8, 4, 32>}]} {
    %c0 = arith.constant 0 : index
    %c0_0 = arith.constant 0 : index
    %c0_1 = arith.constant 0 : index
    %0 = vector.load %arg2[%c0, %c0_0, %c0_1] : memref<8x4x16xf32, #tpu.memory_space<vmem>>, vector<8x4x16xf32>
    %c0_2 = arith.constant 0 : index
    %c0_3 = arith.constant 0 : index
    %c0_4 = arith.constant 0 : index
    %1 = vector.load %arg3[%c0_2, %c0_3, %c0_4] : memref<8x4x32xf32, #tpu.memory_space<vmem>>, vector<8x4x32xf32>
    %2 = vector.extract_strided_slice %0 {offsets = [0, 0, 0], sizes = [8, 1, 16], strides = [1, 1, 1]} : vector<8x4x16xf32> to vector<8x1x16xf32>
    %3 = vector.shape_cast %2 : vector<8x1x16xf32> to vector<8x16xf32>
    %4 = vector.extract_strided_slice %1 {offsets = [0, 0, 0], sizes = [8, 1, 32], strides = [1, 1, 1]} : vector<8x4x32xf32> to vector<8x1x32xf32>
    %5 = vector.shape_cast %4 : vector<8x1x32xf32> to vector<8x32xf32>
    %6 = tpu.concatenate %3, %5 in 1 : vector<8x16xf32>, vector<8x32xf32> -> vector<8x48xf32>
    %c0_5 = arith.constant 0 : index
    %c0_6 = arith.constant 0 : index
    %c0_7 = arith.constant 0 : index
    %7 = vector.load %arg4[%c0_5, %c0_6, %c0_7] : memref<4x48x128xf32, #tpu.memory_space<vmem>>, vector<1x48x128xf32>
    %8 = vector.shape_cast %7 : vector<1x48x128xf32> to vector<48x128xf32>
    %cst = arith.constant dense<0.000000e+00> : vector<8x128xf32>
    %9 = tpu.matmul %6, %8, %cst {dimension_numbers = #tpu.dot_dimension_numbers<[1], [0], [0], [1], [0, 0, 1, 1], [], []>} : vector<8x48xf32>, vector<48x128xf32>, vector<8x128xf32> -> vector<8x128xf32>
    %10 = vector.extract_strided_slice %9 {offsets = [0, 0], sizes = [8, 64], strides = [1, 1]} : vector<8x128xf32> to vector<8x64xf32>
    %11 = vector.extract_strided_slice %9 {offsets = [0, 64], sizes = [8, 32], strides = [1, 1]} : vector<8x128xf32> to vector<8x32xf32>
    %12 = vector.extract_strided_slice %9 {offsets = [0, 96], sizes = [8, 32], strides = [1, 1]} : vector<8x128xf32> to vector<8x32xf32>
    %cst_8 = arith.constant 5.000000e-01 : f32
    %13 = vector.broadcast %cst_8 : f32 to vector<8x64xf32>
    %14 = arith.mulf %13, %10 : vector<8x64xf32>
    %15 = math.tanh %14 : vector<8x64xf32>
    %cst_9 = arith.constant 1.000000e+00 : f32
    %16 = vector.broadcast %cst_9 : f32 to vector<8x64xf32>
    %17 = arith.addf %15, %16 : vector<8x64xf32>
    %cst_10 = arith.constant 5.000000e-01 : f32
    %18 = vector.broadcast %cst_10 : f32 to vector<8x64xf32>
    %19 = arith.mulf %18, %17 : vector<8x64xf32>
    %20 = vector.extract_strided_slice %19 {offsets = [0, 0], sizes = [8, 32], strides = [1, 1]} : vector<8x64xf32> to vector<8x32xf32>
    %21 = vector.extract_strided_slice %19 {offsets = [0, 32], sizes = [8, 32], strides = [1, 1]} : vector<8x64xf32> to vector<8x32xf32>
    %22 = arith.mulf %20, %12 : vector<8x32xf32>
    %23 = arith.addf %11, %22 : vector<8x32xf32>
    %24 = math.tanh %23 : vector<8x32xf32>
    %25 = arith.subf %5, %24 : vector<8x32xf32>
    %26 = arith.mulf %21, %25 : vector<8x32xf32>
    %27 = arith.addf %24, %26 : vector<8x32xf32>
    %28 = vector.extract_strided_slice %0 {offsets = [0, 1, 0], sizes = [8, 1, 16], strides = [1, 1, 1]} : vector<8x4x16xf32> to vector<8x1x16xf32>
    %29 = vector.shape_cast %28 : vector<8x1x16xf32> to vector<8x16xf32>
    %30 = vector.extract_strided_slice %1 {offsets = [0, 1, 0], sizes = [8, 1, 32], strides = [1, 1, 1]} : vector<8x4x32xf32> to vector<8x1x32xf32>
    %31 = vector.shape_cast %30 : vector<8x1x32xf32> to vector<8x32xf32>
    %32 = tpu.concatenate %29, %31 in 1 : vector<8x16xf32>, vector<8x32xf32> -> vector<8x48xf32>
    %c1 = arith.constant 1 : index
    %c0_11 = arith.constant 0 : index
    %c0_12 = arith.constant 0 : index
    %33 = vector.load %arg4[%c1, %c0_11, %c0_12] : memref<4x48x128xf32, #tpu.memory_space<vmem>>, vector<1x48x128xf32>
    %34 = vector.shape_cast %33 : vector<1x48x128xf32> to vector<48x128xf32>
    %cst_13 = arith.constant dense<0.000000e+00> : vector<8x128xf32>
    %35 = tpu.matmul %32, %34, %cst_13 {dimension_numbers = #tpu.dot_dimension_numbers<[1], [0], [0], [1], [0, 0, 1, 1], [], []>} : vector<8x48xf32>, vector<48x128xf32>, vector<8x128xf32> -> vector<8x128xf32>
    %36 = vector.extract_strided_slice %35 {offsets = [0, 0], sizes = [8, 64], strides = [1, 1]} : vector<8x128xf32> to vector<8x64xf32>
    %37 = vector.extract_strided_slice %35 {offsets = [0, 64], sizes = [8, 32], strides = [1, 1]} : vector<8x128xf32> to vector<8x32xf32>
    %38 = vector.extract_strided_slice %35 {offsets = [0, 96], sizes = [8, 32], strides = [1, 1]} : vector<8x128xf32> to vector<8x32xf32>
    %cst_14 = arith.constant 5.000000e-01 : f32
    %39 = vector.broadcast %cst_14 : f32 to vector<8x64xf32>
    %40 = arith.mulf %39, %36 : vector<8x64xf32>
    %41 = math.tanh %40 : vector<8x64xf32>
    %cst_15 = arith.constant 1.000000e+00 : f32
    %42 = vector.broadcast %cst_15 : f32 to vector<8x64xf32>
    %43 = arith.addf %41, %42 : vector<8x64xf32>
    %cst_16 = arith.constant 5.000000e-01 : f32
    %44 = vector.broadcast %cst_16 : f32 to vector<8x64xf32>
    %45 = arith.mulf %44, %43 : vector<8x64xf32>
    %46 = vector.extract_strided_slice %45 {offsets = [0, 0], sizes = [8, 32], strides = [1, 1]} : vector<8x64xf32> to vector<8x32xf32>
    %47 = vector.extract_strided_slice %45 {offsets = [0, 32], sizes = [8, 32], strides = [1, 1]} : vector<8x64xf32> to vector<8x32xf32>
    %48 = arith.mulf %46, %38 : vector<8x32xf32>
    %49 = arith.addf %37, %48 : vector<8x32xf32>
    %50 = math.tanh %49 : vector<8x32xf32>
    %51 = arith.subf %31, %50 : vector<8x32xf32>
    %52 = arith.mulf %47, %51 : vector<8x32xf32>
    %53 = arith.addf %50, %52 : vector<8x32xf32>
    %54 = vector.extract_strided_slice %0 {offsets = [0, 2, 0], sizes = [8, 1, 16], strides = [1, 1, 1]} : vector<8x4x16xf32> to vector<8x1x16xf32>
    %55 = vector.shape_cast %54 : vector<8x1x16xf32> to vector<8x16xf32>
    %56 = vector.extract_strided_slice %1 {offsets = [0, 2, 0], sizes = [8, 1, 32], strides = [1, 1, 1]} : vector<8x4x32xf32> to vector<8x1x32xf32>
    %57 = vector.shape_cast %56 : vector<8x1x32xf32> to vector<8x32xf32>
    %58 = tpu.concatenate %55, %57 in 1 : vector<8x16xf32>, vector<8x32xf32> -> vector<8x48xf32>
    %c2 = arith.constant 2 : index
    %c0_17 = arith.constant 0 : index
    %c0_18 = arith.constant 0 : index
    %59 = vector.load %arg4[%c2, %c0_17, %c0_18] : memref<4x48x128xf32, #tpu.memory_space<vmem>>, vector<1x48x128xf32>
    %60 = vector.shape_cast %59 : vector<1x48x128xf32> to vector<48x128xf32>
    %cst_19 = arith.constant dense<0.000000e+00> : vector<8x128xf32>
    %61 = tpu.matmul %58, %60, %cst_19 {dimension_numbers = #tpu.dot_dimension_numbers<[1], [0], [0], [1], [0, 0, 1, 1], [], []>} : vector<8x48xf32>, vector<48x128xf32>, vector<8x128xf32> -> vector<8x128xf32>
    %62 = vector.extract_strided_slice %61 {offsets = [0, 0], sizes = [8, 64], strides = [1, 1]} : vector<8x128xf32> to vector<8x64xf32>
    %63 = vector.extract_strided_slice %61 {offsets = [0, 64], sizes = [8, 32], strides = [1, 1]} : vector<8x128xf32> to vector<8x32xf32>
    %64 = vector.extract_strided_slice %61 {offsets = [0, 96], sizes = [8, 32], strides = [1, 1]} : vector<8x128xf32> to vector<8x32xf32>
    %cst_20 = arith.constant 5.000000e-01 : f32
    %65 = vector.broadcast %cst_20 : f32 to vector<8x64xf32>
    %66 = arith.mulf %65, %62 : vector<8x64xf32>
    %67 = math.tanh %66 : vector<8x64xf32>
    %cst_21 = arith.constant 1.000000e+00 : f32
    %68 = vector.broadcast %cst_21 : f32 to vector<8x64xf32>
    %69 = arith.addf %67, %68 : vector<8x64xf32>
    %cst_22 = arith.constant 5.000000e-01 : f32
    %70 = vector.broadcast %cst_22 : f32 to vector<8x64xf32>
    %71 = arith.mulf %70, %69 : vector<8x64xf32>
    %72 = vector.extract_strided_slice %71 {offsets = [0, 0], sizes = [8, 32], strides = [1, 1]} : vector<8x64xf32> to vector<8x32xf32>
    %73 = vector.extract_strided_slice %71 {offsets = [0, 32], sizes = [8, 32], strides = [1, 1]} : vector<8x64xf32> to vector<8x32xf32>
    %74 = arith.mulf %72, %64 : vector<8x32xf32>
    %75 = arith.addf %63, %74 : vector<8x32xf32>
    %76 = math.tanh %75 : vector<8x32xf32>
    %77 = arith.subf %57, %76 : vector<8x32xf32>
    %78 = arith.mulf %73, %77 : vector<8x32xf32>
    %79 = arith.addf %76, %78 : vector<8x32xf32>
    %80 = vector.extract_strided_slice %0 {offsets = [0, 3, 0], sizes = [8, 1, 16], strides = [1, 1, 1]} : vector<8x4x16xf32> to vector<8x1x16xf32>
    %81 = vector.shape_cast %80 : vector<8x1x16xf32> to vector<8x16xf32>
    %82 = vector.extract_strided_slice %1 {offsets = [0, 3, 0], sizes = [8, 1, 32], strides = [1, 1, 1]} : vector<8x4x32xf32> to vector<8x1x32xf32>
    %83 = vector.shape_cast %82 : vector<8x1x32xf32> to vector<8x32xf32>
    %84 = tpu.concatenate %81, %83 in 1 : vector<8x16xf32>, vector<8x32xf32> -> vector<8x48xf32>
    %c3 = arith.constant 3 : index
    %c0_23 = arith.constant 0 : index
    %c0_24 = arith.constant 0 : index
    %85 = vector.load %arg4[%c3, %c0_23, %c0_24] : memref<4x48x128xf32, #tpu.memory_space<vmem>>, vector<1x48x128xf32>
    %86 = vector.shape_cast %85 : vector<1x48x128xf32> to vector<48x128xf32>
    %cst_25 = arith.constant dense<0.000000e+00> : vector<8x128xf32>
    %87 = tpu.matmul %84, %86, %cst_25 {dimension_numbers = #tpu.dot_dimension_numbers<[1], [0], [0], [1], [0, 0, 1, 1], [], []>} : vector<8x48xf32>, vector<48x128xf32>, vector<8x128xf32> -> vector<8x128xf32>
    %88 = vector.extract_strided_slice %87 {offsets = [0, 0], sizes = [8, 64], strides = [1, 1]} : vector<8x128xf32> to vector<8x64xf32>
    %89 = vector.extract_strided_slice %87 {offsets = [0, 64], sizes = [8, 32], strides = [1, 1]} : vector<8x128xf32> to vector<8x32xf32>
    %90 = vector.extract_strided_slice %87 {offsets = [0, 96], sizes = [8, 32], strides = [1, 1]} : vector<8x128xf32> to vector<8x32xf32>
    %cst_26 = arith.constant 5.000000e-01 : f32
    %91 = vector.broadcast %cst_26 : f32 to vector<8x64xf32>
    %92 = arith.mulf %91, %88 : vector<8x64xf32>
    %93 = math.tanh %92 : vector<8x64xf32>
    %cst_27 = arith.constant 1.000000e+00 : f32
    %94 = vector.broadcast %cst_27 : f32 to vector<8x64xf32>
    %95 = arith.addf %93, %94 : vector<8x64xf32>
    %cst_28 = arith.constant 5.000000e-01 : f32
    %96 = vector.broadcast %cst_28 : f32 to vector<8x64xf32>
    %97 = arith.mulf %96, %95 : vector<8x64xf32>
    %98 = vector.extract_strided_slice %97 {offsets = [0, 0], sizes = [8, 32], strides = [1, 1]} : vector<8x64xf32> to vector<8x32xf32>
    %99 = vector.extract_strided_slice %97 {offsets = [0, 32], sizes = [8, 32], strides = [1, 1]} : vector<8x64xf32> to vector<8x32xf32>
    %100 = arith.mulf %98, %90 : vector<8x32xf32>
    %101 = arith.addf %89, %100 : vector<8x32xf32>
    %102 = math.tanh %101 : vector<8x32xf32>
    %103 = arith.subf %83, %102 : vector<8x32xf32>
    %104 = arith.mulf %99, %103 : vector<8x32xf32>
    %105 = arith.addf %102, %104 : vector<8x32xf32>
    %106 = vector.shape_cast %27 : vector<8x32xf32> to vector<8x1x32xf32>
    %107 = vector.shape_cast %53 : vector<8x32xf32> to vector<8x1x32xf32>
    %108 = vector.shape_cast %79 : vector<8x32xf32> to vector<8x1x32xf32>
    %109 = vector.shape_cast %105 : vector<8x32xf32> to vector<8x1x32xf32>
    %110 = tpu.concatenate %106, %107, %108, %109 in 1 : vector<8x1x32xf32>, vector<8x1x32xf32>, vector<8x1x32xf32>, vector<8x1x32xf32> -> vector<8x4x32xf32>
    %c0_29 = arith.constant 0 : index
    %c0_30 = arith.constant 0 : index
    %c0_31 = arith.constant 0 : index
    %111 = vector.load %arg5[%c0_29, %c0_30, %c0_31] : memref<8x4x32xf32, #tpu.memory_space<vmem>>, vector<8x4x32xf32>
    tpu.vector_store %arg5[%c0_29, %c0_30, %c0_31], %110 {strides = array<i32>} : memref<8x4x32xf32, #tpu.memory_space<vmem>>, vector<8x4x32xf32>,
    return
  }
  func.func @transform_0(%arg0: i32, %arg1: i32) -> (i32, i32, i32) {
    %c0_i32 = arith.constant 0 : i32
    %c0_i32_0 = arith.constant 0 : i32
    return %arg1, %arg0, %c0_i32 : i32, i32, i32
  }
  func.func @transform_1(%arg0: i32, %arg1: i32) -> (i32, i32, i32) {
    %c0_i32 = arith.constant 0 : i32
    %c0_i32_0 = arith.constant 0 : i32
    return %arg1, %arg0, %c0_i32 : i32, i32, i32
  }
  func.func @transform_2(%arg0: i32, %arg1: i32) -> (i32, i32, i32) {
    %c0_i32 = arith.constant 0 : i32
    %c0_i32_0 = arith.constant 0 : i32
    %c0_i32_1 = arith.constant 0 : i32
    return %arg0, %c0_i32, %c0_i32_0 : i32, i32, i32
  }
  func.func @transform_3(%arg0: i32, %arg1: i32) -> (i32, i32, i32) {
    %c0_i32 = arith.constant 0 : i32
    %c0_i32_0 = arith.constant 0 : i32
    return %arg1, %arg0, %c0_i32 : i32, i32, i32
  }
}

</mosaic_0001>

<bundles_post_ra>
// kernel: tpu_custom_call.1
= control target key start
LH: loop header
LB: loop body
LE: loop exit
PB: predicated region body
PF: predicated region fallthrough
CT: control target
= control target key end

     0   :  { %8 = vsyncpa [#allocation3], 0  ;;  %s2049_s0 = inlined_call_operand.hbm [shape: f32[8,4,16], index: 0, kind: input, shape index: {}]   ;;  %s2050_s1 = inlined_call_operand.hbm [shape: f32[8,4,32], index: 1, kind: input, shape index: {}]   ;;  %s2051_s2 = inlined_call_operand.hbm [shape: f32[4,48,128], index: 2, kind: input, shape index: {}]   ;;  %s2052_s3 = inlined_call_operand.hbm [shape: f32[8,4,32], index: 3, kind: output, shape index: {}]  }
   0x1   :  { %9 = vsyncpa [#allocation6], 0 }
   0x2   :  { %10 = vsyncpa [#allocation4], 0  ;;  %s1540_s12 = smov [#allocation5]   ;;  %s1541_s14 = smov [#allocation2]  }
   0x3   :  { %s28_s13 = sshll.u32 %s1540_s12, 4  ;;  %s16_s15 = sshll.u32 %s1541_s14, 4  ;;  %s29_s13 = int_to_ptr.vmem [resolvable:$true] %s28_s13  ;;  %s1574_s15 = int_to_ptr.vmem [resolvable:$true] %s16_s15 }
   0x4   :  { %s1446_s18 = scalar_lea.hbm %s2050_s1, 512 }
   0x5   :  { %p1447_p0 = scmp.ne.s32.totalorder %s2050_s1, %s1446_s18  ;;  %p1450_p1 = scmp.lt.u32.totalorder %s1446_s18, %s2050_s1 }
   0x7   :  { %p1452_p2 = pnand %p1450_p1, %p1447_p0 }
   0x9   :  { %1455 = shalt.err (!%p1452_p2)
}
   0xa   :  { %s1456_s23 = scalar_lea.vmem %s29_s13, 512  ;;  %p1461_p4 = scmp.lt.s32.totalorder %s29_s13, %s29_s13 }
   0xb   :  { %p1457_p3 = scmp.ne.s32.totalorder %s29_s13, %s1456_s23  ;;  %p1462_p5 = scmp.lt.s32.totalorder %s1456_s23, %s1456_s23 }
   0xd   :  { %p1463_p6 = por %p1462_p5, %p1461_p4 }
   0xf   :  { %p1464_p7 = pnand %p1463_p6, %p1457_p3 }
  0x11   :  { %1467 = shalt.err (!%p1464_p7)
}
  0x12   :  { %s1542_s24 = smov 64   ;;  %s1543_s25 = smov 4  }
  0x13   :  { %34 = dma.hbm_to_vmem [thread:$0]  %s2050_s1, 512, %s29_s13, [#allocation6], %s1542_s24, %s1542_s24, %s1543_s25  }
  0x14   :  { %s1468_s30 = scalar_lea.hbm %s2049_s0, 512 }
  0x15   :  { %p1469_p8 = scmp.ne.s32.totalorder %s2049_s0, %s1468_s30  ;;  %p1472_p9 = scmp.lt.u32.totalorder %s1468_s30, %s2049_s0 }
  0x17   :  { %p1474_p10 = pnand %p1472_p9, %p1469_p8 }
  0x19   :  { %1477 = shalt.err (!%p1474_p10)
}
  0x1a   :  { %s1478_s8 = scalar_lea.vmem %s1574_s15, 512  ;;  %p1483_p12 = scmp.lt.s32.totalorder %s1574_s15, %s1574_s15 }
  0x1b   :  { %p1479_p11 = scmp.ne.s32.totalorder %s1574_s15, %s1478_s8  ;;  %p1484_p13 = scmp.lt.s32.totalorder %s1478_s8, %s1478_s8 }
  0x1d   :  { %p1485_p0 = por %p1484_p13, %p1483_p12 }
  0x1f   :  { %p1486_p1 = pnand %p1485_p0, %p1479_p11 }
  0x21   :  { %1489 = shalt.err (!%p1486_p1)
}
  0x22   :  { %22 = dma.hbm_to_vmem [thread:$0]  %s2049_s0, 512, %s1574_s15, [#allocation3], %s1542_s24, %s1542_s24, %s1543_s25  }
  0x23   :  { %s1544_s10 = smov [#allocation7]   ;;  %s1490_s14 = scalar_lea.hbm %s2051_s2, 3072 }
  0x24   :  { %s40_s11 = sshll.u32 %s1544_s10, 4  ;;  %p1491_p2 = scmp.ne.s32.totalorder %s2051_s2, %s1490_s14  ;;  %s41_s11 = int_to_ptr.vmem [resolvable:$true] %s40_s11 }
  0x25   :  { %p1494_p3 = scmp.lt.u32.totalorder %s1490_s14, %s2051_s2 }
  0x27   :  { %p1496_p4 = pnand %p1494_p3, %p1491_p2 }
  0x29   :  { %1499 = shalt.err (!%p1496_p4)
}
  0x2a   :  { %s1500_s20 = scalar_lea.vmem %s41_s11, 3072  ;;  %p1505_p6 = scmp.lt.s32.totalorder %s41_s11, %s41_s11 }
  0x2b   :  { %p1501_p5 = scmp.ne.s32.totalorder %s41_s11, %s1500_s20  ;;  %p1506_p7 = scmp.lt.s32.totalorder %s1500_s20, %s1500_s20 }
  0x2d   :  { %p1507_p8 = por %p1506_p7, %p1505_p6 }
  0x2f   :  { %p1508_p9 = pnand %p1507_p8, %p1501_p5 }
  0x31   :  { %1511 = shalt.err (!%p1508_p9)
}
  0x32   :  { %s1545_s0 = smov 128   ;;  %s1546_s15 = smov 8  }
  0x33   :  { %46 = dma.hbm_to_vmem [thread:$0]  %s2051_s2, 3072, %s41_s11, [#allocation6], %s1545_s0, %s1545_s0, %s1546_s15  }
  0x34   :  { %1534 = dma.done.wait [#allocation3], 512  }
  0x35   :  { %1535 = vsyncadd [#allocation3], 4294966784 }
  0x36   :  { %1536 = dma.done.wait [#allocation6], 3584  }
  0x37   :  { %1537 = vsyncadd [#allocation6], 4294963712  ;;  %v1547_v0 = vmov 0.0|0.0   ;;  %vm1548_vm0 = vmmov 0   ;;  %v1549_v1 = vmov 0.0   ;;  %vm84_vm1 = vcmask 1042434  }
  0x38   :  { %1380 = vmatprep.subr.bf16.mxu0 %v1547_v0  ;;  %1389 = vmatprep.subr.bf16.mxu1 %v1547_v0  ;;  %vm87_vm2 = vcmask 1043459   ;;  %vm81_vm3 = vcmask 1041409   ;;  %v1629_v2 = vld [vmem:[#allocation5] sm:$0xf]  ;;  %v1631_v3 = vld [vmem:[#allocation5 + $0x4] sm:$0xf] }
  0x39   :  { %1332 = vmatprep.mubr.msk.f32.mxu0 %vm1548_vm0, %v1549_v1  ;;  %1347 = vmatprep.mubr.msk.f32.mxu1 %vm1548_vm0, %v1549_v1  ;;  %v1633_v4 = vld [vmem:[#allocation5 + $0x8] sm:$0xf]  ;;  %v1635_v5 = vld [vmem:[#allocation5 + $0xc] sm:$0xf]  ;;  %v1637_v6 = vld [vmem:[#allocation5 + $0x10] sm:$0xf] }
  0x3a   :  { %v1639_v7 = vld [vmem:[#allocation5 + $0x14] sm:$0xf]  ;;  %v1641_v8 = vld [vmem:[#allocation5 + $0x18] sm:$0xf]  ;;  %vm90_vm4 = vcmask 1044484   ;;  %v110_v9 = vrot.slane %v1631_v3, 7 }
  0x3b   :  { %v112_v10 = vrot.slane %v1633_v4, 6  ;;  %v114_v11 = vrot.slane %v1635_v5, 5  ;;  %vm93_vm5 = vcmask 1045509   ;;  %vm96_vm6 = vcmask 1046534   ;;  %v1647_v13 = vld [vmem:[#allocation5 + $0x1c] sm:$0xf] }
  0x3c   :  { %vm99_vm7 = vcmask 1047559   ;;  %v116_v12 = vrot.slane %v1637_v6, 4  ;;  %v118_v14 = vrot.slane %v1639_v7, 3  ;;  %v303_v15 = vsel %vm84_vm1, %v110_v9, %v1629_v2  ;;  %v129_v26 = vld [vmem:[#allocation7] sm:$0xff]  ;;  %v130_v27 = vld [vmem:[#allocation7 + $0x8] sm:$0xff]  ;;  %v318_v30 = vld [vmem:[#allocation7 + $0x30] sm:$0xff] }
  0x3d   :  { %v111_v16 = vsel %vm81_vm3, %v110_v9, %v1629_v2  ;;  %v496_v17 = vsel %vm87_vm2, %v110_v9, %v1629_v2  ;;  %v120_v18 = vrot.slane %v1641_v8, 2  ;;  %v304_v19 = vsel %vm87_vm2, %v112_v10, %v303_v15  ;;  %v319_v31 = vld [vmem:[#allocation7 + $0x38] sm:$0xff]  ;;  %v131_v35 = vld [vmem:[#allocation7 + $0x10] sm:$0xff]  ;;  %s1550_s2 = smov 16   ;;  %v320_v44 = vld [vmem:[#allocation7 + $0x40] sm:$0xff]  ;;  %s1551_s23 = smov 32  }
  0x3e   :  { %v113_v20 = vsel %vm84_vm1, %v112_v10, %v111_v16  ;;  %v497_v21 = vsel %vm90_vm4, %v112_v10, %v496_v17  ;;  %v305_v22 = vsel %vm90_vm4, %v114_v11, %v304_v19  ;;  %v122_v24 = vrot.slane %v1647_v13, 1  ;;  %v132_v36 = vld [vmem:[#allocation7 + $0x18] sm:$0xff]  ;;  %v321_v45 = vld [vmem:[#allocation7 + $0x48] sm:$0xff]  ;;  %v133_v48 = vld [vmem:[#allocation7 + $0x20] sm:$0xff]  ;;  %s1553_s26 = smov [#allocation8]  }
  0x3f   :  { %v115_v23 = vsel %vm87_vm2, %v114_v11, %v113_v20  ;;  %v498_v25 = vsel %vm93_vm5, %v114_v11, %v497_v21  ;;  %v306_v28 = vsel %vm93_vm5, %v116_v12, %v305_v22  ;;  %v689_v34 = vsel %vm90_vm4, %v110_v9, %v1629_v2  ;;  %v134_v49 = vld [vmem:[#allocation7 + $0x28] sm:$0xff]  ;;  %v322_v52 = vld [vmem:[#allocation7 + $0x50] sm:$0xff]  ;;  %v323_v53 = vld [vmem:[#allocation7 + $0x58] sm:$0xff]  ;;  %s1275_s27 = sshll.u32 %s1553_s26, 4  ;;  %s1276_s27 = int_to_ptr.vmem [resolvable:$true] %s1275_s27 }
  0x40   :  { %v117_v29 = vsel %vm90_vm4, %v116_v12, %v115_v23  ;;  %v307_v32 = vsel %vm96_vm6, %v118_v14, %v306_v28  ;;  %v499_v39 = vsel %vm96_vm6, %v116_v12, %v498_v25  ;;  %v1381_v40 = vpack.c.bf16 %v130_v27, %v129_v26  ;;  %v57_v60 = vld [vmem:[#allocation2 + $0x4] sm:$0xf]  ;;  %v58_v61 = vld [vmem:[#allocation2 + $0x8] sm:$0xf]  ;;  %v56_v63 = vld [vmem:[#allocation2] sm:$0xf]  ;;  %p1517_p11 = scmp.lt.s32.totalorder %s1276_s27, %s1276_s27 }
  0x41   :  { %v119_v33 = vsel %vm93_vm5, %v118_v14, %v117_v29  ;;  %v308_v37 = vsel %vm99_vm7, %v120_v18, %v307_v32  ;;  %v690_v42 = vsel %vm93_vm5, %v112_v10, %v689_v34  ;;  %v1390_v43 = vpack.c.bf16 %v319_v31, %v318_v30  ;;  %v59_v9 = vld [vmem:[#allocation2 + $0xc] sm:$0xf]  ;;  %v61_v17 = vld [vmem:[#allocation2 + $0x14] sm:$0xf]  ;;  %v62_v21 = vld [vmem:[#allocation2 + $0x18] sm:$0xf] }
  0x42   :  { %v121_v38 = vsel %vm96_vm6, %v120_v18, %v119_v33  ;;  %309 = vrot.lane.b32.xlu0 %v308_v37, %s1550_s2  ;;  %1382 = vmatpush3.bf16.msra.mxu0 %v1381_v40  ;;  %v1384_v46 = vpack.c.bf16 %v132_v36, %v131_v35  ;;  %v500_v47 = vsel %vm99_vm7, %v118_v14, %v499_v39  ;;  %v80_v62 = vrot.slane %v57_v60, 7  ;;  %v63_v27 = vld [vmem:[#allocation2 + $0x1c] sm:$0xf]  ;;  %v511_v34 = vld [vmem:[#allocation7 + $0x60] sm:$0xff]  ;;  %v512_v35 = vld [vmem:[#allocation7 + $0x68] sm:$0xff]  ;;  %s1512_s28 = scalar_lea.vmem %s1276_s27, 512 }
  0x43   :  { %v123_v41 = vsel %vm99_vm7, %v122_v24, %v121_v38  ;;  %1383 = vmatprep.subr.bf16.mxu0 %v1547_v0  ;;  %1391 = vmatpush3.bf16.msra.mxu1 %v1390_v43  ;;  %v691_v50 = vsel %vm96_vm6, %v114_v11, %v690_v42  ;;  %v1393_v51 = vpack.c.bf16 %v321_v45, %v320_v44  ;;  %v83_v10 = vrot.slane %v58_v61, 6  ;;  %v513_v44 = vld [vmem:[#allocation7 + $0x70] sm:$0xff]  ;;  %v514_v45 = vld [vmem:[#allocation7 + $0x78] sm:$0xff]  ;;  %p1513_p10 = scmp.ne.s32.totalorder %s1276_s27, %s1512_s28  ;;  %p1518_p12 = scmp.lt.s32.totalorder %s1512_s28, %s1512_s28 }
  0x44   :  { %124 = vrot.lane.b32.xlu1 %v123_v41, %s1550_s2  ;;  %1392 = vmatprep.subr.bf16.mxu1 %v1547_v0  ;;  %v501_v54 = vsel %vm81_vm3, %v122_v24, %v120_v18  ;;  %v1387_v55 = vpack.c.bf16 %v134_v49, %v133_v48  ;;  %v693_v56 = vsel %vm81_vm3, %v120_v18, %v118_v14  ;;  %v86_v14 = vrot.slane %v59_v9, 5  ;;  %v706_v9 = vld [vmem:[#allocation7 + $0xa0] sm:$0xff] }
  0x45   :  { %v692_v57 = vsel %vm99_vm7, %v116_v12, %v691_v50  ;;  %v1396_v58 = vpack.c.bf16 %v323_v53, %v322_v52  ;;  %v694_v59 = vsel %vm84_vm1, %v122_v24, %v693_v56  ;;  %v82_v11 = vsel %vm81_vm3, %v80_v62, %v56_v63  ;;  %v60_v12 = vld [vmem:[#allocation2 + $0x10] sm:$0xf]  ;;  %p1519_p13 = por %p1518_p12, %p1517_p11 }
  0x46   :  { %311 = vrot.lane.b32.xlu0 %v122_v24, %s1550_s2  ;;  %1385 = vmatpush3.bf16.msra.mxu0 %v1384_v46  ;;  %v85_v15 = vsel %vm84_vm1, %v83_v10, %v82_v11  ;;  %v295_v16 = vsel %vm84_vm1, %v80_v62, %v56_v63  ;;  %v89_v18 = vrot.slane %v60_v12, 4  ;;  %v92_v22 = vrot.slane %v61_v17, 3  ;;  %v704_v50 = vld [vmem:[#allocation7 + $0x90] sm:$0xff] }
  0x47   :  { %1386 = vmatprep.subr.bf16.mxu0 %v1547_v0  ;;  %1394 = vmatpush3.bf16.msra.mxu1 %v1393_v51  ;;  %v88_v19 = vsel %vm87_vm2, %v86_v14, %v85_v15  ;;  %v296_v20 = vsel %vm87_vm2, %v83_v10, %v295_v16  ;;  %v488_v25 = vsel %vm87_vm2, %v80_v62, %v56_v63  ;;  %v95_v26 = vrot.slane %v62_v21, 2  ;;  %v705_v51 = vld [vmem:[#allocation7 + $0x98] sm:$0xff]  ;;  %p1520_p0 = pnand %p1519_p13, %p1513_p10 }
  0x48   :  { %502 = vrot.lane.b32.xlu1 %v500_v47, %s1550_s2  ;;  %1395 = vmatprep.subr.bf16.mxu1 %v1547_v0  ;;  %v91_v23 = vsel %vm90_vm4, %v89_v18, %v88_v19  ;;  %v297_v24 = vsel %vm90_vm4, %v86_v14, %v296_v20  ;;  %v489_v30 = vsel %vm90_vm4, %v83_v10, %v488_v25  ;;  %v98_v31 = vrot.slane %v63_v27, 1  ;;  %v709_v25 = vld [vmem:[#allocation7 + $0xb8] sm:$0xff] }
  0x49   :  { %v94_v28 = vsel %vm93_vm5, %v92_v22, %v91_v23  ;;  %v298_v29 = vsel %vm93_vm5, %v89_v18, %v297_v24  ;;  %v490_v36 = vsel %vm93_vm5, %v86_v14, %v489_v30  ;;  %vm127_vm8 = vcmask 130048   ;;  %v708_v24 = vld [vmem:[#allocation7 + $0xb0] sm:$0xff] }
  0x4a   :  { %504 = vrot.lane.b32.xlu0 %v501_v54, %s1550_s2  ;;  %1388 = vmatpush3.bf16.msra.mxu0 %v1387_v55  ;;  %v97_v32 = vsel %vm96_vm6, %v95_v26, %v94_v28  ;;  %v299_v33 = vsel %vm96_vm6, %v92_v22, %v298_v29  ;;  %v681_v38 = vsel %vm90_vm4, %v80_v62, %v56_v63  ;;  %vm135_vm9 = vcmask 392192  }
  0x4b   :  { %1398 = vmatprep.subr.bf16.mxu0 %v1547_v0  ;;  %1397 = vmatpush3.bf16.msra.mxu1 %v1396_v58  ;;  %v100_v37 = vsel %vm99_vm7, %v98_v31, %v97_v32  ;;  %v300_v40 = vsel %vm99_vm7, %v95_v26, %v299_v33  ;;  %v1399_v41 = vpack.c.bf16 %v512_v35, %v511_v34  ;;  %vm326_vm10 = vcmask 1046528   ;;  %v516_v58 = vld [vmem:[#allocation7 + $0x88] sm:$0xff] }
  0x4c   :  { %695 = vrot.lane.b32.xlu1 %v692_v57, %s1550_s2  ;;  %1407 = vmatprep.subr.bf16.mxu1 %v1547_v0  ;;  %v491_v42 = vsel %vm96_vm6, %v89_v18, %v490_v36  ;;  %v682_v47 = vsel %vm93_vm5, %v83_v10, %v681_v38  ;;  %v1402_v53 = vpack.c.bf16 %v514_v45, %v513_v44  ;;  %v515_v57 = vld [vmem:[#allocation7 + $0x80] sm:$0xff]  ;;  %v707_v10 = vld [vmem:[#allocation7 + $0xa8] sm:$0xff]  ;;  %vm519_vm11 = vcmask 1045504  }
  0x4d   :  { %v492_v49 = vsel %vm99_vm7, %v92_v22, %v491_v42  ;;  %v493_v55 = vsel %vm81_vm3, %v98_v31, %v95_v26  ;;  %v1408_v63 = vpack.c.bf16 %v705_v51, %v704_v50  ;;  %v685_v11 = vsel %vm81_vm3, %v95_v26, %v92_v22 }
  0x4e   :  { %697 = vrot.lane.b32.xlu0 %v694_v59, %s1550_s2  ;;  %v683_v59 = vsel %vm96_vm6, %v86_v14, %v682_v47  ;;  %v1405_v17 = vpack.c.bf16 %v516_v58, %v515_v57  ;;  %v1411_v23 = vpack.c.bf16 %v707_v10, %v706_v9  ;;  %v686_v22 = vsel %vm84_vm1, %v98_v31, %v685_v11 }
  0x4f   :  { %v684_v19 = vsel %vm99_vm7, %v89_v18, %v683_v59  ;;  %v1414_v32 = vpack.c.bf16 %v709_v25, %v708_v24  ;;  %vm712_vm12 = vcmask 1044480   ;;  %vm1202_vm13 = vcmask 1040384  }
  0x50   :  { %vm1211_vm14 = vcmask 1041408   ;;  %vm1220_vm15 = vcmask 1042432  }
  0xb4   :  { %v310_v39 = vpop.permute.xlu0 %309 }
  0xb5   :  { %v315_v48 = vsel %vm127_vm8, %v300_v40, %v310_v39 }
  0xb6   :  { %v125_v43 = vpop.permute.xlu1 %124  ;;  %v327_v60 = vrot.slane %v315_v48, 1 }
  0xb7   :  { %v128_v46 = vsel %vm127_vm8, %v100_v37, %v125_v43 }
  0xb8   :  { %1333 = vmatmul.mubr.msk.f32.vlgmr.msra.gmra.mrb[0].mxu0 %vm135_vm9, %v128_v46  ;;  %v312_v52 = vpop.permute.xlu0 %311 }
  0xb9   :  { %1400 = vmatpush3.bf16.msra.mxu0 %v1399_v41  ;;  %1362 = vmatprep.mubr.msk.f32.mxu0 %vm1548_vm0, %v1549_v1  ;;  %v316_v54 = vsel %vm127_vm8, %v98_v31, %v312_v52 }
  0xba   :  { %1401 = vmatprep.subr.bf16.mxu0 %v1547_v0  ;;  %v503_v56 = vpop.permute.xlu1 %502  ;;  %v328_v61 = vrot.slane %v316_v54, 1 }
  0xbb   :  { %v508_v62 = vsel %vm127_vm8, %v492_v49, %v503_v56 }
  0xbc   :  { %v505_v12 = vpop.permute.xlu0 %504  ;;  %v520_v15 = vrot.slane %v508_v62, 2  ;;  %v329_v16 = vsel %vm326_vm10, %v327_v60, %v328_v61 }
  0xbd   :  { %1403 = vmatpush3.bf16.msra.mxu0 %v1402_v53  ;;  %v509_v20 = vsel %vm127_vm8, %v493_v55, %v505_v12  ;;  %1348 = vmatmul.mubr.msk.f32.vlgmr.msra.gmra.mrb[0].mxu1 %vm135_vm9, %v329_v16 }
  0xbe   :  { %1404 = vmatprep.subr.bf16.mxu0 %v1547_v0  ;;  %v696_v14 = vpop.permute.xlu1 %695  ;;  %v521_v21 = vrot.slane %v509_v20, 2  ;;  %1409 = vmatpush3.bf16.msra.mxu1 %v1408_v63 }
  0xbf   :  { %1377 = vmatprep.mubr.msk.f32.mxu1 %vm1548_vm0, %v1549_v1  ;;  %1410 = vmatprep.subr.bf16.mxu1 %v1547_v0  ;;  %v701_v18 = vsel %vm127_vm8, %v684_v19, %v696_v14  ;;  %vm1261_vm0 = vcmask 257024  }
  0xc0   :  { %v522_v26 = vsel %vm519_vm11, %v520_v15, %v521_v21  ;;  %v698_v27 = vpop.permute.xlu0 %697  ;;  %v713_v30 = vrot.slane %v701_v18, 3 }
  0xc1   :  { %1406 = vmatpush3.bf16.msra.mxu0 %v1405_v17  ;;  %v702_v28 = vsel %vm127_vm8, %v686_v22, %v698_v27 }
  0xc2   :  { %1412 = vmatpush3.bf16.msra.mxu1 %v1411_v23  ;;  %v714_v29 = vrot.slane %v702_v28, 3 }
  0xc3   :  { %1413 = vmatprep.subr.bf16.mxu1 %v1547_v0 }
  0xc4   :  { %1363 = vmatmul.mubr.msk.f32.vlgmr.msra.gmra.mrb[2].mxu0 %vm135_vm9, %v522_v26  ;;  %v715_v1 = vsel %vm712_vm12, %v713_v30, %v714_v29 }
  0xc6   :  { %1415 = vmatpush3.bf16.msra.mxu1 %v1414_v32 }
  0xc9   :  { %1378 = vmatmul.mubr.msk.f32.vlgmr.msra.gmra.mrb[2].mxu1 %vm135_vm9, %v715_v1 }
 0x18b   :  { %v205_v31 = vpop.f32.mrb[0].mxu0 }
 0x18c   :  { %v1334_v33 = vpop.f32.mrb[1].mxu0  ;;  %v209_v40 = vmul.f32 0.5, %v205_v31 }
 0x190   :  { %v398_v34 = vpop.f32.mrb[0].mxu1 }
 0x191   :  { %407 = vrot.lane.b32.xlu1 %v398_v34, %s1551_s23  ;;  %v1349_v35 = vpop.f32.mrb[1].mxu1  ;;  %v402_v39 = vmul.f32 0.5, %v398_v34 }
 0x193   :  { %1430 = vtanh.f32 %v402_v39 }
 0x194   :  { %1432 = vtanh.f32 %v209_v40 }
 0x195   :  { %214 = vrot.lane.b32.xlu1 %v205_v31, %s1551_s23 }
 0x197   :  { %v591_v36 = vpop.f32.mrb[2].mxu0 }
 0x198   :  { %600 = vrot.lane.b32.xlu0 %v591_v36, %s1551_s23  ;;  %v1364_v37 = vpop.f32.mrb[3].mxu0  ;;  %v595_v41 = vmul.f32 0.5, %v591_v36 }
 0x19a   :  { %1434 = vtanh.f32 %v595_v41 }
 0x19c   :  { %v1741_v38 = vpop.f32.mrb[2].mxu1 }
 0x19d   :  { %793 = vrot.lane.b32.xlu0 %v1741_v38, %s1551_s23  ;;  %v1379_v0 = vpop.f32.mrb[3].mxu1  ;;  %v788_v42 = vmul.f32 0.5, %v1741_v38  ;;  %v1431_v43 = vpop.eup %1430 }
 0x19e   :  { %v404_v44 = vadd.f32 1.0, %v1431_v43  ;;  %v1433_v45 = vpop.eup %1432 }
 0x19f   :  { %1436 = vtanh.f32 %v788_v42  ;;  %v211_v48 = vadd.f32 1.0, %v1433_v45 }
 0x1a0   :  { %v1746_v47 = vmul.f32 0.5, %v404_v44 }
 0x1a1   :  { %v1750_v52 = vmul.f32 0.5, %v211_v48 }
 0x1a4   :  { %v1435_v46 = vpop.eup %1434 }
 0x1a5   :  { %v597_v51 = vadd.f32 1.0, %v1435_v46 }
 0x1a7   :  { %v1753_v56 = vmul.f32 0.5, %v597_v51 }
 0x1a9   :  { %v1437_v53 = vpop.eup %1436 }
 0x1aa   :  { %v790_v59 = vadd.f32 1.0, %v1437_v53 }
 0x1ac   :  { %v1758_v60 = vmul.f32 0.5, %v790_v59 }
 0x203   :  { %v408_v49 = vpop.permute.xlu1 %407 }
 0x204   :  { %v410_v50 = vmul.f32 %v408_v49, %v1746_v47 }
 0x206   :  { %412 = vrot.lane.b32.xlu1 %v410_v50, %s1542_s24 }
 0x207   :  { %v215_v54 = vpop.permute.xlu1 %214 }
 0x208   :  { %v217_v55 = vmul.f32 %v215_v54, %v1750_v52 }
 0x20a   :  { %v601_v57 = vpop.permute.xlu0 %600  ;;  %219 = vrot.lane.b32.xlu1 %v217_v55, %s1542_s24 }
 0x20b   :  { %v603_v58 = vmul.f32 %v601_v57, %v1753_v56 }
 0x20d   :  { %605 = vrot.lane.b32.xlu0 %v603_v58, %s1542_s24 }
 0x20f   :  { %v794_v61 = vpop.permute.xlu0 %793 }
 0x210   :  { %v796_v62 = vmul.f32 %v794_v61, %v1758_v60 }
 0x212   :  { %798 = vrot.lane.b32.xlu0 %v796_v62, %s1542_s24 }
 0x278   :  { %v413_v63 = vpop.permute.xlu1 %412 }
 0x279   :  { %v415_v11 = vadd.f32 %v413_v63, %v398_v34 }
 0x27c   :  { %v220_v9 = vpop.permute.xlu1 %219 }
 0x27d   :  { %v222_v10 = vadd.f32 %v220_v9, %v205_v31 }
 0x27f   :  { %1438 = vtanh.f32 %v222_v10  ;;  %v606_v14 = vpop.permute.xlu0 %605 }
 0x280   :  { %1440 = vtanh.f32 %v415_v11  ;;  %v608_v22 = vadd.f32 %v606_v14, %v591_v36 }
 0x282   :  { %1442 = vtanh.f32 %v608_v22 }
 0x284   :  { %v799_v29 = vpop.permute.xlu0 %798 }
 0x285   :  { %v801_v1 = vadd.f32 %v799_v29, %v1741_v38 }
 0x287   :  { %1444 = vtanh.f32 %v801_v1 }
 0x289   :  { %v1762_v12 = vpop.eup %1438 }
 0x28a   :  { %232 = vrot.lane.b32.xlu0 %v1762_v12, %s1542_s24  ;;  %v225_v15 = vrot.slane %v1762_v12, 1  ;;  %v1768_v16 = vpop.eup %1440  ;;  %v227_v17 = vrot.slane %v1762_v12, 3  ;;  %v226_v19 = vrot.slane %v1762_v12, 2  ;;  %v228_v20 = vrot.slane %v1762_v12, 4 }
 0x28b   :  { %v230_v21 = vrot.slane %v1762_v12, 6  ;;  %v229_v23 = vrot.slane %v1762_v12, 5  ;;  %v419_v18 = vrot.slane %v1768_v16, 1  ;;  %v418_v24 = vrot.slane %v1768_v16, 7 }
 0x28c   :  { %234 = vrot.lane.b32.xlu1 %v225_v15, %s1542_s24  ;;  %v422_v25 = vrot.slane %v1768_v16, 4  ;;  %v420_v26 = vrot.slane %v1768_v16, 2  ;;  %v423_v27 = vrot.slane %v1768_v16, 5  ;;  %v421_v28 = vrot.slane %v1768_v16, 3  ;;  %v1795_v32 = vpop.eup %1442 }
 0x28d   :  { %v424_v30 = vrot.slane %v1768_v16, 6  ;;  %v612_v31 = vrot.slane %v1795_v32, 7  ;;  %v611_v33 = vrot.slane %v1795_v32, 6  ;;  %v613_v34 = vrot.slane %v1795_v32, 1 }
 0x28e   :  { %427 = vrot.lane.b32.xlu0 %v1768_v16, %s1542_s24  ;;  %v615_v35 = vrot.slane %v1795_v32, 3  ;;  %v614_v36 = vrot.slane %v1795_v32, 2  ;;  %v616_v37 = vrot.slane %v1795_v32, 4  ;;  %v617_v0 = vrot.slane %v1795_v32, 5 }
 0x28f   :  { %v231_v46 = vrot.slane %v1762_v12, 7 }
 0x290   :  { %238 = vrot.lane.b32.xlu1 %v227_v17, %s1542_s24 }
 0x291   :  { %v1813_v38 = vpop.eup %1444 }
 0x292   :  { %236 = vrot.lane.b32.xlu0 %v226_v19, %s1542_s24  ;;  %v804_v39 = vrot.slane %v1813_v38, 5  ;;  %v805_v40 = vrot.slane %v1813_v38, 6  ;;  %v807_v41 = vrot.slane %v1813_v38, 1  ;;  %v806_v42 = vrot.slane %v1813_v38, 7 }
 0x293   :  { %v809_v43 = vrot.slane %v1813_v38, 3  ;;  %v808_v44 = vrot.slane %v1813_v38, 2  ;;  %v810_v45 = vrot.slane %v1813_v38, 4 }
 0x294   :  { %240 = vrot.lane.b32.xlu1 %v228_v20, %s1542_s24 }
 0x296   :  { %244 = vrot.lane.b32.xlu0 %v230_v21, %s1542_s24 }
 0x298   :  { %242 = vrot.lane.b32.xlu1 %v229_v23, %s1542_s24 }
 0x29a   :  { %429 = vrot.lane.b32.xlu0 %v419_v18, %s1542_s24 }
 0x29c   :  { %425 = vrot.lane.b32.xlu1 %v418_v24, %s1542_s24 }
 0x29e   :  { %435 = vrot.lane.b32.xlu0 %v422_v25, %s1542_s24 }
 0x2a0   :  { %431 = vrot.lane.b32.xlu1 %v420_v26, %s1542_s24 }
 0x2a2   :  { %437 = vrot.lane.b32.xlu0 %v423_v27, %s1542_s24 }
 0x2a4   :  { %433 = vrot.lane.b32.xlu1 %v421_v28, %s1542_s24 }
 0x2a6   :  { %439 = vrot.lane.b32.xlu0 %v424_v30, %s1542_s24 }
 0x2a8   :  { %622 = vrot.lane.b32.xlu1 %v1795_v32, %s1542_s24 }
 0x2aa   :  { %620 = vrot.lane.b32.xlu0 %v612_v31, %s1542_s24 }
 0x2ac   :  { %618 = vrot.lane.b32.xlu1 %v611_v33, %s1542_s24 }
 0x2ae   :  { %624 = vrot.lane.b32.xlu0 %v613_v34, %s1542_s24 }
 0x2b0   :  { %628 = vrot.lane.b32.xlu1 %v615_v35, %s1542_s24 }
 0x2b2   :  { %626 = vrot.lane.b32.xlu0 %v614_v36, %s1542_s24 }
 0x2b4   :  { %630 = vrot.lane.b32.xlu1 %v616_v37, %s1542_s24 }
 0x2b6   :  { %817 = vrot.lane.b32.xlu0 %v1813_v38, %s1542_s24 }
 0x2b8   :  { %632 = vrot.lane.b32.xlu1 %v617_v0, %s1542_s24 }
 0x2ba   :  { %811 = vrot.lane.b32.xlu0 %v804_v39, %s1542_s24 }
 0x2bc   :  { %813 = vrot.lane.b32.xlu1 %v805_v40, %s1542_s24 }
 0x2be   :  { %819 = vrot.lane.b32.xlu0 %v807_v41, %s1542_s24 }
 0x2c0   :  { %815 = vrot.lane.b32.xlu1 %v806_v42, %s1542_s24 }
 0x2c2   :  { %823 = vrot.lane.b32.xlu0 %v809_v43, %s1542_s24 }
 0x2c4   :  { %821 = vrot.lane.b32.xlu1 %v808_v44, %s1542_s24 }
 0x2c6   :  { %825 = vrot.lane.b32.xlu0 %v810_v45, %s1542_s24 }
 0x2c8   :  { %246 = vrot.lane.b32.xlu1 %v231_v46, %s1542_s24 }
 0x2fc   :  { %v1835_v48 = vpop.permute.xlu0 %232 }
 0x2fe   :  { %v1837_v49 = vpop.permute.xlu1 %234 }
 0x300   :  { %v428_v50 = vpop.permute.xlu0 %427 }
 0x301   :  { %v450_v15 = vsub.f32 %v1631_v3, %v428_v50 }
 0x302   :  { %v1839_v51 = vpop.permute.xlu1 %238 }
 0x304   :  { %v1841_v53 = vpop.permute.xlu0 %236 }
 0x306   :  { %v1843_v54 = vpop.permute.xlu1 %240 }
 0x308   :  { %v1845_v55 = vpop.permute.xlu0 %244 }
 0x30a   :  { %v1847_v57 = vpop.permute.xlu1 %242 }
 0x30c   :  { %v430_v58 = vpop.permute.xlu0 %429 }
 0x30d   :  { %v451_v10 = vsub.f32 %v1633_v4, %v430_v58 }
 0x30e   :  { %v426_v59 = vpop.permute.xlu1 %425 }
 0x30f   :  { %v449_v61 = vsub.f32 %v1629_v2, %v426_v59  ;;  %v467_v23 = vrot.slane %v451_v10, 7 }
 0x310   :  { %v436_v62 = vpop.permute.xlu0 %435 }
 0x311   :  { %v465_v63 = vrot.slane %v449_v61, 1  ;;  %v454_v20 = vsub.f32 %v1639_v7, %v436_v62 }
 0x312   :  { %v432_v9 = vpop.permute.xlu1 %431 }
 0x313   :  { %v452_v11 = vsub.f32 %v1635_v5, %v432_v9  ;;  %v466_v19 = vsel %vm81_vm3, %v450_v15, %v465_v63  ;;  %v473_v28 = vrot.slane %v454_v20, 4 }
 0x314   :  { %v438_v17 = vpop.permute.xlu0 %437  ;;  %v468_v25 = vsel %vm84_vm1, %v467_v23, %v466_v19 }
 0x315   :  { %v469_v14 = vrot.slane %v452_v11, 6  ;;  %v455_v22 = vsub.f32 %v1641_v8, %v438_v17 }
 0x316   :  { %v434_v21 = vpop.permute.xlu1 %433 }
 0x317   :  { %v453_v18 = vsub.f32 %v1637_v6, %v434_v21  ;;  %v470_v29 = vsel %vm87_vm2, %v469_v14, %v468_v25  ;;  %v475_v1 = vrot.slane %v455_v22, 3  ;;  %v257_v14 = vsub.f32 %v1631_v3, %v1837_v49 }
 0x318   :  { %v440_v24 = vpop.permute.xlu0 %439  ;;  %v258_v22 = vsub.f32 %v1633_v4, %v1841_v53  ;;  %v259_v53 = vsub.f32 %v1635_v5, %v1839_v51 }
 0x319   :  { %v471_v26 = vrot.slane %v453_v18, 5  ;;  %v456_v27 = vsub.f32 %v1647_v13, %v440_v24 }
 0x31a   :  { %v623_v30 = vpop.permute.xlu1 %622 }
 0x31b   :  { %v472_v31 = vsel %vm90_vm4, %v471_v26, %v470_v29  ;;  %v477_v33 = vrot.slane %v456_v27, 2  ;;  %v644_v46 = vsub.f32 %v1633_v4, %v623_v30  ;;  %v272_v27 = vrot.slane %v257_v14, 7 }
 0x31c   :  { %v621_v34 = vpop.permute.xlu0 %620  ;;  %v474_v35 = vsel %vm93_vm5, %v473_v28, %v472_v31  ;;  %v274_v30 = vrot.slane %v258_v22, 6  ;;  %v256_v31 = vsub.f32 %v1629_v2, %v1835_v48  ;;  %v261_v48 = vsub.f32 %v1639_v7, %v1847_v57 }
 0x31d   :  { %v643_v36 = vsub.f32 %v1631_v3, %v621_v34  ;;  %v476_v37 = vsel %vm96_vm6, %v475_v1, %v474_v35  ;;  %v260_v35 = vsub.f32 %v1637_v6, %v1843_v54 }
 0x31e   :  { %v619_v0 = vpop.permute.xlu1 %618  ;;  %v478_v39 = vsel %vm99_vm7, %v477_v33, %v476_v37 }
 0x31f   :  { %v642_v40 = vsub.f32 %v1629_v2, %v619_v0  ;;  %479 = vrot.lane.b32.xlu1 %v478_v39, %s1551_s23  ;;  %v659_v42 = vrot.slane %v643_v36, 1  ;;  %v273_v36 = vsel %vm81_vm3, %v272_v27, %v256_v31 }
 0x320   :  { %v625_v41 = vpop.permute.xlu0 %624  ;;  %v275_v0 = vsel %vm84_vm1, %v274_v30, %v273_v36  ;;  %v1552_v30 = vmov 1966171168  }
 0x321   :  { %v658_v43 = vrot.slane %v642_v40, 2  ;;  %v645_v44 = vsub.f32 %v1635_v5, %v625_v41 }
 0x322   :  { %v629_v45 = vpop.permute.xlu1 %628 }
 0x323   :  { %v660_v50 = vsel %vm81_vm3, %v659_v42, %v658_v43  ;;  %v662_v58 = vrot.slane %v645_v44, 7  ;;  %v647_v62 = vsub.f32 %v1639_v7, %v629_v45  ;;  %v278_v42 = vrot.slane %v260_v35, 4 }
 0x324   :  { %v627_v59 = vpop.permute.xlu0 %626  ;;  %v661_v61 = vsel %vm84_vm1, %v644_v46, %v660_v50 }
 0x325   :  { %v646_v63 = vsub.f32 %v1637_v6, %v627_v59  ;;  %v663_v15 = vsel %vm87_vm2, %v662_v58, %v661_v61  ;;  %v666_v19 = vrot.slane %v647_v62, 5  ;;  %v280_v58 = vrot.slane %v261_v48, 3 }
 0x326   :  { %v631_v9 = vpop.permute.xlu1 %630  ;;  %v262_v59 = vsub.f32 %v1641_v8, %v1845_v55 }
 0x327   :  { %v664_v10 = vrot.slane %v646_v63, 6  ;;  %v648_v11 = vsub.f32 %v1641_v8, %v631_v9 }
 0x328   :  { %v818_v17 = vpop.permute.xlu0 %817 }
 0x329   :  { %v665_v20 = vsel %vm90_vm4, %v664_v10, %v663_v15  ;;  %v668_v21 = vrot.slane %v648_v11, 4  ;;  %v838_v44 = vsub.f32 %v1635_v5, %v818_v17 }
 0x32a   :  { %v633_v23 = vpop.permute.xlu1 %632  ;;  %v667_v24 = vsel %vm93_vm5, %v666_v19, %v665_v20 }
 0x32b   :  { %v649_v18 = vsub.f32 %v1647_v13, %v633_v23  ;;  %v669_v29 = vsel %vm96_vm6, %v668_v21, %v667_v24 }
 0x32c   :  { %v812_v25 = vpop.permute.xlu0 %811 }
 0x32d   :  { %v670_v26 = vrot.slane %v649_v18, 3  ;;  %v835_v33 = vsub.f32 %v1629_v2, %v812_v25  ;;  %v276_v2 = vrot.slane %v259_v53, 5 }
 0x32e   :  { %v814_v28 = vpop.permute.xlu1 %813 }
 0x32f   :  { %v836_v1 = vsub.f32 %v1631_v3, %v814_v28  ;;  %v671_v49 = vsel %vm99_vm7, %v670_v26, %v669_v29  ;;  %v851_v40 = vrot.slane %v835_v33, 3  ;;  %v277_v54 = vsel %vm87_vm2, %v276_v2, %v275_v0 }
 0x330   :  { %672 = vrot.lane.b32.xlu0 %v671_v49, %s1551_s23  ;;  %v820_v34 = vpop.permute.xlu0 %819  ;;  %v279_v10 = vsel %vm90_vm4, %v278_v42, %v277_v54 }
 0x331   :  { %v852_v37 = vrot.slane %v836_v1, 2  ;;  %v839_v39 = vsub.f32 %v1637_v6, %v820_v34  ;;  %v281_v17 = vsel %vm93_vm5, %v280_v58, %v279_v10  ;;  %v877_v1 = vunpack.c.l.s4 %v1552_v30 }
 0x332   :  { %v816_v3 = vpop.permute.xlu1 %815 }
 0x333   :  { %v837_v51 = vsub.f32 %v1633_v4, %v816_v3  ;;  %v853_v45 = vsel %vm81_vm3, %v852_v37, %v851_v40  ;;  %v857_v57 = vrot.slane %v839_v39, 7  ;;  %v878_v31 = vunpack.c.0.s8 %v877_v1 }
 0x334   :  { %v824_v41 = vpop.permute.xlu0 %823 }
 0x335   :  { %v854_v43 = vrot.slane %v837_v51, 1  ;;  %v841_v46 = vsub.f32 %v1641_v8, %v824_v41  ;;  %v282_v8 = vrot.slane %v262_v59, 2 }
 0x336   :  { %v822_v50 = vpop.permute.xlu1 %821 }
 0x337   :  { %v855_v6 = vsel %vm84_vm1, %v854_v43, %v853_v45  ;;  %v840_v4 = vsub.f32 %v1639_v7, %v822_v50  ;;  %v861_v11 = vrot.slane %v841_v46, 5  ;;  %v283_v23 = vsel %vm96_vm6, %v282_v8, %v281_v17 }
 0x338   :  { %v856_v61 = vsel %vm87_vm2, %v838_v44, %v855_v6  ;;  %v826_v62 = vpop.permute.xlu0 %825 }
 0x339   :  { %v858_v63 = vsel %vm90_vm4, %v857_v57, %v856_v61  ;;  %v859_v5 = vrot.slane %v840_v4, 6  ;;  %v842_v9 = vsub.f32 %v1647_v13, %v826_v62 }
 0x33a   :  { %v247_v15 = vpop.permute.xlu1 %246 }
 0x33b   :  { %v860_v19 = vsel %vm93_vm5, %v859_v5, %v858_v63  ;;  %v863_v7 = vrot.slane %v842_v9, 4  ;;  %v263_v20 = vsub.f32 %v1647_v13, %v247_v15 }
 0x33c   :  { %v862_v55 = vsel %vm96_vm6, %v861_v11, %v860_v19 }
 0x33d   :  { %v284_v14 = vrot.slane %v263_v20, 1  ;;  %v864_v21 = vsel %vm99_vm7, %v863_v7, %v862_v55 }
 0x33e   :  { %865 = vrot.lane.b32.xlu0 %v864_v21, %s1551_s23 }
 0x33f   :  { %v285_v22 = vsel %vm99_vm7, %v284_v14, %v283_v23 }
 0x340   :  { %286 = vrot.lane.b32.xlu1 %v285_v22, %s1551_s23 }
 0x391   :  { %v480_v18 = vpop.permute.xlu1 %479 }
 0x392   :  { %v482_v24 = vmul.f32 %v480_v18, %v1746_v47  ;;  %v879_v47 = vlaneseq }
 0x394   :  { %484 = vrot.lane.b32.xlu1 %v482_v24, %s1551_s23  ;;  %v880_v53 = vshrl.u32 %v879_v47, 7 }
 0x396   :  { %v1929_v33 = vsub.s32 %v878_v31, %v880_v53  ;;  %v1936_v2 = vsub.s32 0, %v880_v53 }
 0x3a2   :  { %v673_v13 = vpop.permute.xlu0 %672 }
 0x3a3   :  { %v675_v25 = vmul.f32 %v673_v13, %v1753_v56 }
 0x3a5   :  { %677 = vrot.lane.b32.xlu0 %v675_v25, %s1551_s23 }
 0x3b0   :  { %v866_v26 = vpop.permute.xlu0 %865 }
 0x3b1   :  { %v868_v27 = vmul.f32 %v866_v26, %v1758_v60 }
 0x3b2   :  { %v287_v28 = vpop.permute.xlu1 %286 }
 0x3b3   :  { %v289_v29 = vmul.f32 %v287_v28, %v1750_v52  ;;  %870 = vrot.lane.b32.xlu0 %v868_v27, %s1551_s23 }
 0x3b5   :  { %291 = vrot.lane.b32.xlu1 %v289_v29, %s1551_s23 }
 0x406   :  { %v485_v49 = vpop.permute.xlu1 %484 }
 0x407   :  { %v487_v56 = vadd.f32 %v1768_v16, %v485_v49 }
 0x409   :  { %v933_v35 = vcombine.high %v487_v56, %v487_v56  ;;  %v940_v52 = vrot.slane %v487_v56, %v1929_v33 }
 0x40b   :  { %v947_v36 = vrot.slane %v933_v35, %v1929_v33  ;;  %v948_v3 = vcombine.high %v940_v52, %v940_v52  ;;  %v956_v48 = vrot.slane %v940_v52, %v1929_v33 }
 0x40d   :  { %v949_v0 = vcombine.high %v947_v36, %v947_v36  ;;  %v1939_v16 = vrot.slane %v947_v36, %v1929_v33  ;;  %v970_v40 = vrot.slane %v948_v3, %v1929_v33  ;;  %v978_v41 = vcombine.high %v956_v48, %v956_v48 }
 0x40e   :  { %v1085_v58 = vrot.slane %v956_v48, %v1936_v2 }
 0x40f   :  { %v979_v46 = vcombine.high %v1939_v16, %v1939_v16  ;;  %v980_v50 = vcombine.high %v970_v40, %v970_v40  ;;  %v1089_v6 = vrot.slane %v970_v40, %v1936_v2  ;;  %v1101_v63 = vrot.slane %v1939_v16, %v1936_v2 }
 0x411   :  { %v1097_v7 = vrot.slane %v980_v50, %v1936_v2  ;;  %v1109_v14 = vrot.slane %v979_v46, %v1936_v2 }
 0x417   :  { %v678_v34 = vpop.permute.xlu0 %677 }
 0x418   :  { %v680_v60 = vadd.f32 %v1795_v32, %v678_v34  ;;  %v1943_v32 = vrot.slane %v949_v0, %v1929_v33 }
 0x41a   :  { %v990_v37 = vrot.slane %v680_v60, %v1929_v33  ;;  %v983_v39 = vcombine.high %v680_v60, %v680_v60  ;;  %v981_v62 = vcombine.high %v1943_v32, %v1943_v32 }
 0x41c   :  { %v998_v51 = vcombine.high %v990_v37, %v990_v37  ;;  %v997_v42 = vrot.slane %v983_v39, %v1929_v33  ;;  %v1006_v54 = vrot.slane %v990_v37, %v1929_v33 }
 0x41e   :  { %v1020_v44 = vrot.slane %v998_v51, %v1929_v33  ;;  %v999_v5 = vcombine.high %v997_v42, %v997_v42  ;;  %v1028_v9 = vcombine.high %v1006_v54, %v1006_v54  ;;  %v1013_v20 = vrot.slane %v997_v42, %v1929_v33 }
 0x41f   :  { %v1125_v8 = vrot.slane %v1006_v54, %v1936_v2 }
 0x420   :  { %v1030_v10 = vcombine.high %v1020_v44, %v1020_v44  ;;  %v1027_v24 = vrot.slane %v999_v5, %v1929_v33  ;;  %v1129_v13 = vrot.slane %v1020_v44, %v1936_v2  ;;  %v1133_v25 = vrot.slane %v1028_v9, %v1936_v2 }
 0x421   :  { %v1141_v54 = vrot.slane %v1013_v20, %v1936_v2 }
 0x422   :  { %v1137_v26 = vrot.slane %v1030_v10, %v1936_v2 }
 0x425   :  { %v871_v43 = vpop.permute.xlu0 %870 }
 0x426   :  { %v873_v45 = vadd.f32 %v1813_v38, %v871_v43  ;;  %v1093_v38 = vrot.slane %v978_v41, %v1936_v2  ;;  %v1029_v41 = vcombine.high %v1013_v20, %v1013_v20 }
 0x427   :  { %v292_v57 = vpop.permute.xlu1 %291 }
 0x428   :  { %v1033_v4 = vcombine.high %v873_v45, %v873_v45  ;;  %v1040_v59 = vrot.slane %v873_v45, %v1929_v33  ;;  %v294_v61 = vadd.f32 %v1762_v12, %v292_v57  ;;  %v1105_v12 = vrot.slane %v1943_v32, %v1936_v2 }
 0x429   :  { %v1145_v57 = vrot.slane %v1027_v24, %v1936_v2  ;;  %v1149_v5 = vrot.slane %v1029_v41, %v1936_v2 }
 0x42a   :  { %v1048_v11 = vcombine.high %v1040_v59, %v1040_v59  ;;  %v875_v15 = vcombine.high %v294_v61, %v294_v61  ;;  %v1047_v17 = vrot.slane %v1033_v4, %v1929_v33  ;;  %v882_v19 = vrot.slane %v294_v61, %v1929_v33 }
 0x42b   :  { %v1056_v55 = vrot.slane %v1040_v59, %v1929_v33  ;;  %v1113_v4 = vrot.slane %v981_v62, %v1936_v2 }
 0x42c   :  { %v1070_v21 = vrot.slane %v1048_v11, %v1929_v33  ;;  %v889_v23 = vrot.slane %v875_v15, %v1929_v33  ;;  %v890_v22 = vcombine.high %v882_v19, %v882_v19  ;;  %v898_v18 = vrot.slane %v882_v19, %v1929_v33 }
 0x42d   :  { %v1049_v27 = vcombine.high %v1047_v17, %v1047_v17  ;;  %v1078_v1 = vcombine.high %v1056_v55, %v1056_v55  ;;  %v1165_v49 = vrot.slane %v1056_v55, %v1936_v2  ;;  %v1063_v3 = vrot.slane %v1047_v17, %v1929_v33 }
 0x42e   :  { %v891_v28 = vcombine.high %v889_v23, %v889_v23  ;;  %v912_v29 = vrot.slane %v890_v22, %v1929_v33  ;;  %v920_v30 = vcombine.high %v898_v18, %v898_v18  ;;  %v905_v47 = vrot.slane %v889_v23, %v1929_v33 }
 0x42f   :  { %v1203_v31 = vsel %vm1202_vm13, %v898_v18, %v1085_v58  ;;  %v1169_v34 = vrot.slane %v1070_v21, %v1936_v2  ;;  %v1080_v35 = vcombine.high %v1070_v21, %v1070_v21  ;;  %v1173_v40 = vrot.slane %v1078_v1, %v1936_v2 }
 0x430   :  { %v922_v53 = vcombine.high %v912_v29, %v912_v29  ;;  %v1212_v56 = vsel %vm1211_vm14, %v1203_v31, %v1125_v8  ;;  %v919_v60 = vrot.slane %v891_v28, %v1929_v33  ;;  %v1204_v36 = vsel %vm1202_vm13, %v912_v29, %v1089_v6 }
 0x431   :  { %v1221_v52 = vsel %vm1220_vm15, %v1212_v56, %v1165_v49  ;;  %v1205_v37 = vsel %vm1202_vm13, %v920_v30, %v1093_v38  ;;  %v1213_v0 = vsel %vm1211_vm14, %v1204_v36, %v1129_v13  ;;  %v921_v51 = vcombine.high %v905_v47, %v905_v47 }
 0x432   :  { %1237 = vrot.lane.b32.xlu1 %v1221_v52, %s1542_s24  ;;  %v1214_v48 = vsel %vm1211_vm14, %v1205_v37, %v1133_v25  ;;  %v1206_v39 = vsel %vm1202_vm13, %v922_v53, %v1097_v7  ;;  %v1222_v16 = vsel %vm1220_vm15, %v1213_v0, %v1169_v34  ;;  %v1207_v32 = vsel %vm1202_vm13, %v905_v47, %v1101_v63 }
 0x433   :  { %1239 = vrot.lane.b32.xlu0 %v1222_v16, %s1542_s24  ;;  %v1177_v42 = vrot.slane %v1080_v35, %v1936_v2  ;;  %v1215_v43 = vsel %vm1211_vm14, %v1206_v39, %v1137_v26  ;;  %v1223_v44 = vsel %vm1220_vm15, %v1214_v48, %v1173_v40  ;;  %v1077_v45 = vrot.slane %v1049_v27, %v1929_v33 }
 0x434   :  { %v1208_v46 = vsel %vm1202_vm13, %v919_v60, %v1105_v12  ;;  %v923_v50 = vcombine.high %v919_v60, %v919_v60  ;;  %v1216_v58 = vsel %vm1211_vm14, %v1207_v32, %v1141_v54  ;;  %v1031_v6 = vcombine.high %v1027_v24, %v1027_v24 }
 0x435   :  { %v1224_v59 = vsel %vm1220_vm15, %v1215_v43, %v1177_v42  ;;  %v1181_v61 = vrot.slane %v1063_v3, %v1936_v2  ;;  %v1079_v38 = vcombine.high %v1063_v3, %v1063_v3  ;;  %v1209_v63 = vsel %vm1202_vm13, %v921_v51, %v1109_v14 }
 0x436   :  { %1241 = vrot.lane.b32.xlu1 %v1223_v44, %s1542_s24  ;;  %v1217_v33 = vsel %vm1211_vm14, %v1208_v46, %v1145_v57  ;;  %v1185_v10 = vrot.slane %v1077_v45, %v1936_v2  ;;  %v1081_v11 = vcombine.high %v1077_v45, %v1077_v45  ;;  %v1210_v62 = vsel %vm1202_vm13, %v923_v50, %v1113_v4 }
 0x437   :  { %1243 = vrot.lane.b32.xlu0 %v1224_v59, %s1542_s24  ;;  %v1225_v9 = vsel %vm1220_vm15, %v1216_v58, %v1181_v61  ;;  %v1218_v15 = vsel %vm1211_vm14, %v1209_v63, %v1149_v5  ;;  %v1153_v17 = vrot.slane %v1031_v6, %v1936_v2  ;;  %v1189_v7 = vrot.slane %v1079_v38, %v1936_v2 }
 0x438   :  { %v1226_v19 = vsel %vm1220_vm15, %v1217_v33, %v1185_v10  ;;  %v1193_v8 = vrot.slane %v1081_v11, %v1936_v2 }
 0x439   :  { %v1219_v12 = vsel %vm1211_vm14, %v1210_v62, %v1153_v17  ;;  %v1227_v20 = vsel %vm1220_vm15, %v1218_v15, %v1189_v7 }
 0x43a   :  { %1245 = vrot.lane.b32.xlu1 %v1225_v9, %s1542_s24  ;;  %v1228_v55 = vsel %vm1220_vm15, %v1219_v12, %v1193_v8 }
 0x43b   :  { %1247 = vrot.lane.b32.xlu0 %v1226_v19, %s1542_s24 }
 0x43e   :  { %1249 = vrot.lane.b32.xlu1 %v1227_v20, %s1542_s24 }
 0x43f   :  { %1251 = vrot.lane.b32.xlu0 %v1228_v55, %s1542_s24 }
 0x4a4   :  { %v1238_v14 = vpop.permute.xlu1 %1237 }
 0x4a5   :  { %1262 = vst.msk [vmem:[#allocation8] sm:$0xf] %vm1261_vm0, %v1238_v14  ;;  %v1240_v21 = vpop.permute.xlu0 %1239 }
 0x4a6   :  { %1263 = vst.msk [vmem:[#allocation8 + $0x4] sm:$0xf] %vm1261_vm0, %v1240_v21 }
 0x4a8   :  { %v1242_v23 = vpop.permute.xlu1 %1241 }
 0x4a9   :  { %1264 = vst.msk [vmem:[#allocation8 + $0x8] sm:$0xf] %vm1261_vm0, %v1242_v23  ;;  %v1244_v22 = vpop.permute.xlu0 %1243 }
 0x4aa   :  { %1265 = vst.msk [vmem:[#allocation8 + $0xc] sm:$0xf] %vm1261_vm0, %v1244_v22 }
 0x4ac   :  { %v1246_v2 = vpop.permute.xlu1 %1245 }
 0x4ad   :  { %1266 = vst.msk [vmem:[#allocation8 + $0x10] sm:$0xf] %vm1261_vm0, %v1246_v2  ;;  %v1248_v18 = vpop.permute.xlu0 %1247 }
 0x4ae   :  { %1267 = vst.msk [vmem:[#allocation8 + $0x14] sm:$0xf] %vm1261_vm0, %v1248_v18 }
 0x4b0   :  { %v1250_v24 = vpop.permute.xlu1 %1249 }
 0x4b1   :  { %1268 = vst.msk [vmem:[#allocation8 + $0x18] sm:$0xf] %vm1261_vm0, %v1250_v24  ;;  %v1252_v13 = vpop.permute.xlu0 %1251 }
 0x4b2   :  { %1269 = vst.msk [vmem:[#allocation8 + $0x1c] sm:$0xf] %vm1261_vm0, %v1252_v13 }
 0x4b3   :  { %1523 = shalt.err (!%p1520_p0)
}
 0x4b4   :  { %s1524_s4 = scalar_lea.hbm %s2052_s3, 512 }
 0x4b5   :  { %p1525_p1 = scmp.ne.s32.totalorder %s2052_s3, %s1524_s4  ;;  %p1528_p2 = scmp.lt.u32.totalorder %s1524_s4, %s2052_s3 }
 0x4b7   :  { %p1530_p3 = pnand %p1528_p2, %p1525_p1 }
 0x4b9   :  { %1533 = shalt.err (!%p1530_p3)
}
 0x4ba   :  { %1281 = dma.vmem_to_hbm [thread:$0]  %s1276_s27, 512, %s2052_s3, [#allocation4], %s1542_s24, %s1542_s24, %s1543_s25  }
 0x4bb   :  { %1538 = dma.done.wait [#allocation4], 512  }
 0x4bc   :  { %1539 = vsyncadd [#allocation4], 4294966784 }
 0x4bd   :  { %1285 = vsyncpa [#allocation3], 1 }
 0x4be   :  { %1286 = vsyncpa [#allocation6], 1 }
 0x4bf   :  { %1287 = vsyncpa [#allocation4], 1 }

</bundles_post_ra>
